<compile_context>
chip_gen: v7x
topology: tpu7x:2x2x1
jax: 0.10.0
libtpu: 0.0.40
codegen_flags: <defaults>
</compile_context>

<pallas_src>
import jax
import jax.numpy as jnp
from jax import lax
from jax.experimental import pallas as pl
from jax.experimental.pallas import tpu as pltpu


# ----------------------------------------------------------------------------
# Pallas kernel: one time-block per grid step; hidden state carried in VMEM
# scratch; masked output sum accumulated directly in the resident output block.
# ----------------------------------------------------------------------------
def gru_sum_kernel(gi_ref, len_ref, whh_ref, bias_ref, out_ref, h_sc):
    blk = pl.program_id(0)
    t_blk = gi_ref.shape[0]
    B, H = out_ref.shape

    @pl.when(blk == 0)
    def _():
        h_sc[...] = jnp.zeros_like(h_sc)
        out_ref[...] = jnp.zeros_like(out_ref)

    # Resident operands (constant index_map) -- hoisted out of the time loop.
    lengths = len_ref[...]                        # (B, 1) int32
    w_cat = whh_ref[...]                          # (H, 3H) bf16, [W_hr|W_hz|W_hn]^T
    # Hoisted broadcast: JAX does not CSE broadcast_in_dim, so doing this inside
    # the unrolled loop would re-emit it every timestep.
    bias_full = jnp.broadcast_to(bias_ref[...], (B, 3 * H))   # b_hn on n-lanes only
    t_base = blk * t_blk

    def step(lt, carry):
        h, acc = carry
        gi_t = gi_ref[lt]                         # (B, 3H) lane-dense gate block
        # Single fused MXU pass per timestep: (B,H)@(H,3H) -> (B,3H), f32 acc.
        gh = jnp.dot(h.astype(jnp.bfloat16), w_cat,
                     preferred_element_type=jnp.float32) + bias_full
        # Full-width add + sigmoid (one vreg); only the r/z lanes are consumed.
        s = jax.nn.sigmoid(gi_t + gh)
        r = s[:, :H]
        z = s[:, H:2 * H]
        # n = tanh(i_n + r * (W_hn h + b_hn))  (b_hn already in gh via bias_full)
        n = jnp.tanh(gi_t[:, 2 * H:] + r * gh[:, 2 * H:])
        h_new = (1.0 - z) * n + z * h
        # pack_padded_sequence semantics: padded steps contribute 0 to the sum.
        m = ((t_base + lt) < lengths).astype(jnp.float32)     # (B, 1)
        return h_new, acc + m * h_new

    h, acc = lax.fori_loop(0, t_blk, step, (h_sc[...], out_ref[...]),
                           unroll=min(8, t_blk))
    h_sc[...] = h
    out_ref[...] = acc


# ----------------------------------------------------------------------------
# Wrapper-side parameter prep (shared by kernel path and the matched reference
# so the arithmetic is comparable).
# ----------------------------------------------------------------------------
def _prep_gru_operands(emb, w_ih, w_hh, b_ih, b_hh, H):
    """Hoisted input projection (lane-dense (T, B, 3H)), fused recurrent
    weights (H, 3H) in bf16, and the n-gate hidden bias padded to (1, 3H)."""
    # gi[t, b, :] = W_ih @ x_t  with gates ordered [r | z | n] along lanes.
    gi = jnp.einsum('tbe,ge->tbg', emb, w_ih,
                    precision=lax.Precision.HIGHEST)           # (T, B, 3H) f32
    # Fold b_ih (all gates) and b_hh (r, z gates) into gi; b_hn must be added
    # before the r-multiply so it stays on the recurrent side.
    fold = jnp.concatenate([b_ih[:2 * H] + b_hh[:2 * H], b_ih[2 * H:]])
    gi = gi + fold[None, None, :]
    # Fused recurrent weights for right-multiplication by h (bf16, f32 acc).
    w_cat = jnp.transpose(w_hh).astype(jnp.bfloat16)           # (H, 3H)
    bias_n = jnp.concatenate(
        [jnp.zeros((2 * H,), jnp.float32), b_hh[2 * H:]]).reshape(1, 3 * H)
    return gi, w_cat, bias_n


def sent_model_forward(emb, lengths, w_ih, w_hh, b_ih, b_hh, w_l, b_l, *,
                       t_blk=64):
    """emb: [T, B, E] f32 (time-major), lengths: [B] int. Returns [B] f32."""
    T, B, E = emb.shape
    H = w_hh.shape[1]
    G = 3 * H

    gi, w_cat, bias_n = _prep_gru_operands(emb, w_ih, w_hh, b_ih, b_hh, H)

    t_blk = max(1, min(int(t_blk), T))
    n_blk = pl.cdiv(T, t_blk)
    T_pad = n_blk * t_blk
    if T_pad != T:
        # Zero-padded tail timesteps; they are masked out by the length compare.
        gi = jnp.pad(gi, ((0, T_pad - T), (0, 0), (0, 0)))

    len2 = lengths.astype(jnp.int32).reshape(B, 1)

    # VMEM budget: double-buffered gi block + resident operands + headroom.
    gi_block_bytes = t_blk * B * G * gi.dtype.itemsize
    resident_bytes = (w_cat.size * 2 + bias_n.size * 4 + len2.size * 4
                      + 3 * B * H * 4)
    vmem_limit = int(min(max(2 * gi_block_bytes + resident_bytes + (4 << 20),
                             16 << 20),
                         64 << 20))   # keep within v7x's 64 MiB physical VMEM

    acc = pl.pallas_call(
        gru_sum_kernel,
        out_shape=jax.ShapeDtypeStruct((B, H), jnp.float32),
        grid_spec=pltpu.PrefetchScalarGridSpec(
            num_scalar_prefetch=0,
            grid=(n_blk,),
            in_specs=[
                pl.BlockSpec((t_blk, B, G), lambda i: (i, 0, 0)),  # gi time-block
                pl.BlockSpec((B, 1), lambda i: (0, 0)),            # lengths (resident)
                pl.BlockSpec((H, G), lambda i: (0, 0)),            # W_hh^T fused (resident)
                pl.BlockSpec((1, G), lambda i: (0, 0)),            # b_hn (resident)
            ],
            out_specs=pl.BlockSpec((B, H), lambda i: (0, 0)),
            scratch_shapes=[pltpu.VMEM((B, H), jnp.float32)],      # hidden state
        ),
        compiler_params=pltpu.CompilerParams(
            dimension_semantics=("arbitrary",),
            vmem_limit_bytes=vmem_limit),
    )(gi, len2, w_cat, bias_n)

    # Lane-dense kernel output: the (H -> 1) head + sigmoid is a pathological
    # MXU shape, so it is applied here as a plain XLA dot.
    logits = acc @ w_l.T + b_l                                     # (B, 1)
    return jax.nn.sigmoid(logits)[:, 0]


# ----------------------------------------------------------------------------
# Reference 1: identical arithmetic (bf16 recurrent weights, same folding) --
# tight-tolerance check of the kernel itself.
# ----------------------------------------------------------------------------
def reference_forward_matched(emb, lengths, w_ih, w_hh, b_ih, b_hh, w_l, b_l):
    T, B, E = emb.shape
    H = w_hh.shape[1]
    gi, w_cat, bias_n = _prep_gru_operands(emb, w_ih, w_hh, b_ih, b_hh, H)

    def step(carry, inp):
        h, acc = carry
        g, t = inp                                              # g: (B, 3H)
        gh = jnp.dot(h.astype(jnp.bfloat16), w_cat,
                     preferred_element_type=jnp.float32) + bias_n
        r = jax.nn.sigmoid(g[:, :H] + gh[:, :H])
        z = jax.nn.sigmoid(g[:, H:2 * H] + gh[:, H:2 * H])
        n = jnp.tanh(g[:, 2 * H:] + r * gh[:, 2 * H:])
        h_new = (1.0 - z) * n + z * h
        m = (t < lengths).astype(jnp.float32)[:, None]
        return (h_new, acc + m * h_new), None

    z0 = jnp.zeros((B, H), jnp.float32)
    (_, acc), _ = lax.scan(step, (z0, z0), (gi, jnp.arange(T)))
    logits = acc @ w_l.T + b_l
    return jax.nn.sigmoid(logits)[:, 0]


# ----------------------------------------------------------------------------
# Reference 2: independent pure-f32 GRU (PyTorch-parity reference, HIGHEST
# precision) -- looser tolerance, detects drift from bf16 recurrent weights.
# ----------------------------------------------------------------------------
def reference_forward_f32(emb, lengths, w_ih, w_hh, b_ih, b_hh, w_l, b_l):
    T, B, E = emb.shape
    H = w_hh.shape[1]
    hp = lax.Precision.HIGHEST

    def step(carry, inp):
        h, acc = carry
        x_t, t = inp
        gi = jnp.dot(x_t, w_ih.T, precision=hp) + b_ih
        gh = jnp.dot(h, w_hh.T, precision=hp) + b_hh
        r = jax.nn.sigmoid(gi[:, :H] + gh[:, :H])
        z = jax.nn.sigmoid(gi[:, H:2 * H] + gh[:, H:2 * H])
        n = jnp.tanh(gi[:, 2 * H:] + r * gh[:, 2 * H:])
        h_cand = (1.0 - z) * n + z * h
        m = (t < lengths)[:, None]
        h_new = jnp.where(m, h_cand, h)        # packed-GRU: h frozen when padded
        acc = acc + jnp.where(m, h_new, 0.0)
        return (h_new, acc), None

    z0 = jnp.zeros((B, H), jnp.float32)
    (_, acc), _ = lax.scan(step, (z0, z0), (emb, jnp.arange(T)))
    logits = jnp.dot(acc, w_l.T, precision=hp) + b_l
    return jax.nn.sigmoid(logits)[:, 0]


if __name__ == "__main__":
    # Small, deterministic setup.
    VOCAB = 12          # includes <pad> at index 0
    PAD_ID = 0
    E = 16              # embed_size
    H = 32              # hidden_size
    B = 8               # batch (number of sentences)
    T = 16              # max sequence length

    key = jax.random.PRNGKey(0)
    k_emb, k_ih, k_hh, k_bih, k_bhh, k_l, k_ids, k_len = jax.random.split(key, 8)

    # Parameters (deterministic init; synthetic, not a checkpoint).
    embed_table = 0.1 * jax.random.normal(k_emb, (VOCAB, E), jnp.float32)
    embed_table = embed_table.at[PAD_ID].set(0.0)          # padding_idx row = 0
    w_ih = 0.1 * jax.random.normal(k_ih, (3 * H, E), jnp.float32)
    w_hh = 0.1 * jax.random.normal(k_hh, (3 * H, H), jnp.float32)
    b_ih = 0.1 * jax.random.normal(k_bih, (3 * H,), jnp.float32)
    b_hh = 0.1 * jax.random.normal(k_bhh, (3 * H,), jnp.float32)
    w_l = 0.1 * jax.random.normal(k_l, (1, H), jnp.float32)
    b_l = jnp.zeros((1,), jnp.float32)

    # TODO(synk): to_input_tensor / lang.word2id tokenization is string-side
    # glue; we synthesize integer token ids + lengths directly.
    lengths = jnp.sort(
        jax.random.randint(k_len, (B,), 2, T + 1), descending=True)  # sorted, like packed seqs
    ids = jax.random.randint(k_ids, (T, B), 1, VOCAB)                # [T, B], time-major
    t_idx = jnp.arange(T)[:, None]
    valid = t_idx < lengths[None, :]                                 # [T, B]
    ids = jnp.where(valid, ids, PAD_ID)

    # Embedding gather in plain JAX (glue).
    emb = embed_table[ids]                                           # [T, B, E]

    # t_blk=8 here so the tiny test exercises multiple grid steps (carry of the
    # hidden state / accumulator across time blocks); the default is 64.
    out = sent_model_forward(emb, lengths, w_ih, w_hh, b_ih, b_hh, w_l, b_l,
                             t_blk=8)
    out = jax.block_until_ready(out)
    assert out.shape == (B,)

    ref_m = reference_forward_matched(emb, lengths, w_ih, w_hh, b_ih, b_hh,
                                      w_l, b_l)
    assert jnp.allclose(out, ref_m, atol=1e-4, rtol=1e-4), (out, ref_m)

    ref_f32 = reference_forward_f32(emb, lengths, w_ih, w_hh, b_ih, b_hh,
                                    w_l, b_l)
    assert jnp.allclose(out, ref_f32, atol=5e-3, rtol=5e-3), (out, ref_f32)

    print("KERNEL_OK")
</pallas_src>

<mosaic_0001>
module attributes {stable_mosaic.version = 11 : i64} {
  func.func @gru_sum_kernel(%arg0: i32, %arg1: memref<8x8x96xf32, #tpu.memory_space<vmem>>, %arg2: memref<8x1xi32, #tpu.memory_space<vmem>>, %arg3: memref<32x96xbf16, #tpu.memory_space<vmem>>, %arg4: memref<1x96xf32, #tpu.memory_space<vmem>>, %arg5: memref<8x32xf32, #tpu.memory_space<vmem>>, %arg6: memref<8x32xf32, #tpu.memory_space<vmem>>) attributes {dimension_semantics = [#tpu.dimension_semantics<arbitrary>], iteration_bounds = array<i64: 2>, scalar_prefetch = 0 : i64, scratch_operands = 1 : i64, tpu.core_type = #tpu.core_type<tc>, window_params = [{transform_indices = @transform_0, window_bounds = array<i64: 8, 8, 96>}, {pipeline_mode = #tpu.pipeline_mode<synchronous>, transform_indices = @transform_1, window_bounds = array<i64: 8, 1>}, {pipeline_mode = #tpu.pipeline_mode<synchronous>, transform_indices = @transform_2, window_bounds = array<i64: 32, 96>}, {pipeline_mode = #tpu.pipeline_mode<synchronous>, transform_indices = @transform_3, window_bounds = array<i64: 1, 96>}, {pipeline_mode = #tpu.pipeline_mode<synchronous>, transform_indices = @transform_4, window_bounds = array<i64: 8, 32>}]} {
    %c0_i32 = arith.constant 0 : i32
    %0 = arith.cmpi eq, %arg0, %c0_i32 : i32
    %1 = arith.extui %0 : i1 to i32
    %c0_i32_0 = arith.constant 0 : i32
    %2 = arith.cmpi ne, %1, %c0_i32_0 : i32
    scf.if %2 {
      %cst_55 = arith.constant 0.000000e+00 : f32
      %269 = vector.broadcast %cst_55 : f32 to vector<8x32xf32>
      %c0_56 = arith.constant 0 : index
      %c0_57 = arith.constant 0 : index
      %270 = vector.load %arg6[%c0_56, %c0_57] : memref<8x32xf32, #tpu.memory_space<vmem>>, vector<8x32xf32>
      tpu.vector_store %arg6[%c0_56, %c0_57], %269 {strides = array<i32>} : memref<8x32xf32, #tpu.memory_space<vmem>>, vector<8x32xf32>,
      %cst_58 = arith.constant 0.000000e+00 : f32
      %271 = vector.broadcast %cst_58 : f32 to vector<8x32xf32>
      %c0_59 = arith.constant 0 : index
      %c0_60 = arith.constant 0 : index
      %272 = vector.load %arg5[%c0_59, %c0_60] : memref<8x32xf32, #tpu.memory_space<vmem>>, vector<8x32xf32>
      tpu.vector_store %arg5[%c0_59, %c0_60], %271 {strides = array<i32>} : memref<8x32xf32, #tpu.memory_space<vmem>>, vector<8x32xf32>,
    } else {
    }
    %c0 = arith.constant 0 : index
    %c0_1 = arith.constant 0 : index
    %3 = vector.load %arg2[%c0, %c0_1] : memref<8x1xi32, #tpu.memory_space<vmem>>, vector<8x1xi32>
    %c0_2 = arith.constant 0 : index
    %c0_3 = arith.constant 0 : index
    %4 = vector.load %arg3[%c0_2, %c0_3] : memref<32x96xbf16, #tpu.memory_space<vmem>>, vector<32x96xbf16>
    %c0_4 = arith.constant 0 : index
    %c0_5 = arith.constant 0 : index
    %5 = vector.load %arg4[%c0_4, %c0_5] : memref<1x96xf32, #tpu.memory_space<vmem>>, vector<1x96xf32>
    %6 = vector.shape_cast %5 : vector<1x96xf32> to vector<1x96xf32>
    %7 = vector.broadcast %6 : vector<1x96xf32> to vector<8x96xf32>
    %c8_i32 = arith.constant 8 : i32
    %8 = arith.muli %arg0, %c8_i32 : i32
    %c0_6 = arith.constant 0 : index
    %c0_7 = arith.constant 0 : index
    %9 = vector.load %arg6[%c0_6, %c0_7] : memref<8x32xf32, #tpu.memory_space<vmem>>, vector<8x32xf32>
    %c0_8 = arith.constant 0 : index
    %c0_9 = arith.constant 0 : index
    %10 = vector.load %arg5[%c0_8, %c0_9] : memref<8x32xf32, #tpu.memory_space<vmem>>, vector<8x32xf32>
    %c0_i32_10 = arith.constant 0 : i32
    %11 = arith.index_cast %c0_i32_10 : i32 to index
    %c0_11 = arith.constant 0 : index
    %c0_12 = arith.constant 0 : index
    %12 = vector.load %arg1[%11, %c0_11, %c0_12] : memref<8x8x96xf32, #tpu.memory_space<vmem>>, vector<1x8x96xf32>
    %13 = vector.shape_cast %12 : vector<1x8x96xf32> to vector<8x96xf32>
    %14 = arith.truncf %9 : vector<8x32xf32> to vector<8x32xbf16>
    %cst = arith.constant dense<0.000000e+00> : vector<8x96xf32>
    %15 = tpu.matmul %14, %4, %cst {dimension_numbers = #tpu.dot_dimension_numbers<[1], [0], [0], [1], [0, 0, 1, 1], [], []>} : vector<8x32xbf16>, vector<32x96xbf16>, vector<8x96xf32> -> vector<8x96xf32>
    %16 = arith.addf %15, %7 : vector<8x96xf32>
    %17 = arith.addf %13, %16 : vector<8x96xf32>
    %18 = arith.negf %17 : vector<8x96xf32>
    %19 = math.exp %18 : vector<8x96xf32>
    %cst_13 = arith.constant 1.000000e+00 : f32
    %20 = vector.broadcast %cst_13 : f32 to vector<8x96xf32>
    %21 = arith.addf %20, %19 : vector<8x96xf32>
    %22 = arith.divf %20, %21 : vector<8x96xf32>
    %23 = vector.extract_strided_slice %22 {offsets = [0, 0], sizes = [8, 32], strides = [1, 1]} : vector<8x96xf32> to vector<8x32xf32>
    %24 = vector.extract_strided_slice %22 {offsets = [0, 32], sizes = [8, 32], strides = [1, 1]} : vector<8x96xf32> to vector<8x32xf32>
    %25 = vector.extract_strided_slice %13 {offsets = [0, 64], sizes = [8, 32], strides = [1, 1]} : vector<8x96xf32> to vector<8x32xf32>
    %26 = vector.extract_strided_slice %16 {offsets = [0, 64], sizes = [8, 32], strides = [1, 1]} : vector<8x96xf32> to vector<8x32xf32>
    %27 = arith.mulf %23, %26 : vector<8x32xf32>
    %28 = arith.addf %25, %27 : vector<8x32xf32>
    %29 = math.tanh %28 : vector<8x32xf32>
    %cst_14 = arith.constant 1.000000e+00 : f32
    %30 = vector.broadcast %cst_14 : f32 to vector<8x32xf32>
    %31 = arith.subf %30, %24 : vector<8x32xf32>
    %32 = arith.mulf %31, %29 : vector<8x32xf32>
    %33 = arith.mulf %24, %9 : vector<8x32xf32>
    %34 = arith.addf %32, %33 : vector<8x32xf32>
    %35 = arith.addi %8, %c0_i32_10 : i32
    %36 = vector.broadcast %35 : i32 to vector<8x1xi32>
    %37 = arith.cmpi slt, %36, %3 : vector<8x1xi32>
    %38 = arith.extui %37 : vector<8x1xi1> to vector<8x1xi32>
    %39 = arith.sitofp %38 : vector<8x1xi32> to vector<8x1xf32>
    %40 = vector.broadcast %39 : vector<8x1xf32> to vector<8x32xf32>
    %41 = arith.mulf %40, %34 : vector<8x32xf32>
    %42 = arith.addf %10, %41 : vector<8x32xf32>
    %c1_i32 = arith.constant 1 : i32
    %43 = arith.index_cast %c1_i32 : i32 to index
    %c0_15 = arith.constant 0 : index
    %c0_16 = arith.constant 0 : index
    %44 = vector.load %arg1[%43, %c0_15, %c0_16] : memref<8x8x96xf32, #tpu.memory_space<vmem>>, vector<1x8x96xf32>
    %45 = vector.shape_cast %44 : vector<1x8x96xf32> to vector<8x96xf32>
    %46 = arith.truncf %34 : vector<8x32xf32> to vector<8x32xbf16>
    %cst_17 = arith.constant dense<0.000000e+00> : vector<8x96xf32>
    %47 = tpu.matmul %46, %4, %cst_17 {dimension_numbers = #tpu.dot_dimension_numbers<[1], [0], [0], [1], [0, 0, 1, 1], [], []>} : vector<8x32xbf16>, vector<32x96xbf16>, vector<8x96xf32> -> vector<8x96xf32>
    %48 = arith.addf %47, %7 : vector<8x96xf32>
    %49 = arith.addf %45, %48 : vector<8x96xf32>
    %50 = arith.negf %49 : vector<8x96xf32>
    %51 = math.exp %50 : vector<8x96xf32>
    %cst_18 = arith.constant 1.000000e+00 : f32
    %52 = vector.broadcast %cst_18 : f32 to vector<8x96xf32>
    %53 = arith.addf %52, %51 : vector<8x96xf32>
    %54 = arith.divf %52, %53 : vector<8x96xf32>
    %55 = vector.extract_strided_slice %54 {offsets = [0, 0], sizes = [8, 32], strides = [1, 1]} : vector<8x96xf32> to vector<8x32xf32>
    %56 = vector.extract_strided_slice %54 {offsets = [0, 32], sizes = [8, 32], strides = [1, 1]} : vector<8x96xf32> to vector<8x32xf32>
    %57 = vector.extract_strided_slice %45 {offsets = [0, 64], sizes = [8, 32], strides = [1, 1]} : vector<8x96xf32> to vector<8x32xf32>
    %58 = vector.extract_strided_slice %48 {offsets = [0, 64], sizes = [8, 32], strides = [1, 1]} : vector<8x96xf32> to vector<8x32xf32>
    %59 = arith.mulf %55, %58 : vector<8x32xf32>
    %60 = arith.addf %57, %59 : vector<8x32xf32>
    %61 = math.tanh %60 : vector<8x32xf32>
    %cst_19 = arith.constant 1.000000e+00 : f32
    %62 = vector.broadcast %cst_19 : f32 to vector<8x32xf32>
    %63 = arith.subf %62, %56 : vector<8x32xf32>
    %64 = arith.mulf %63, %61 : vector<8x32xf32>
    %65 = arith.mulf %56, %34 : vector<8x32xf32>
    %66 = arith.addf %64, %65 : vector<8x32xf32>
    %67 = arith.addi %8, %c1_i32 : i32
    %68 = vector.broadcast %67 : i32 to vector<8x1xi32>
    %69 = arith.cmpi slt, %68, %3 : vector<8x1xi32>
    %70 = arith.extui %69 : vector<8x1xi1> to vector<8x1xi32>
    %71 = arith.sitofp %70 : vector<8x1xi32> to vector<8x1xf32>
    %72 = vector.broadcast %71 : vector<8x1xf32> to vector<8x32xf32>
    %73 = arith.mulf %72, %66 : vector<8x32xf32>
    %74 = arith.addf %42, %73 : vector<8x32xf32>
    %c2_i32 = arith.constant 2 : i32
    %75 = arith.index_cast %c2_i32 : i32 to index
    %c0_20 = arith.constant 0 : index
    %c0_21 = arith.constant 0 : index
    %76 = vector.load %arg1[%75, %c0_20, %c0_21] : memref<8x8x96xf32, #tpu.memory_space<vmem>>, vector<1x8x96xf32>
    %77 = vector.shape_cast %76 : vector<1x8x96xf32> to vector<8x96xf32>
    %78 = arith.truncf %66 : vector<8x32xf32> to vector<8x32xbf16>
    %cst_22 = arith.constant dense<0.000000e+00> : vector<8x96xf32>
    %79 = tpu.matmul %78, %4, %cst_22 {dimension_numbers = #tpu.dot_dimension_numbers<[1], [0], [0], [1], [0, 0, 1, 1], [], []>} : vector<8x32xbf16>, vector<32x96xbf16>, vector<8x96xf32> -> vector<8x96xf32>
    %80 = arith.addf %79, %7 : vector<8x96xf32>
    %81 = arith.addf %77, %80 : vector<8x96xf32>
    %82 = arith.negf %81 : vector<8x96xf32>
    %83 = math.exp %82 : vector<8x96xf32>
    %cst_23 = arith.constant 1.000000e+00 : f32
    %84 = vector.broadcast %cst_23 : f32 to vector<8x96xf32>
    %85 = arith.addf %84, %83 : vector<8x96xf32>
    %86 = arith.divf %84, %85 : vector<8x96xf32>
    %87 = vector.extract_strided_slice %86 {offsets = [0, 0], sizes = [8, 32], strides = [1, 1]} : vector<8x96xf32> to vector<8x32xf32>
    %88 = vector.extract_strided_slice %86 {offsets = [0, 32], sizes = [8, 32], strides = [1, 1]} : vector<8x96xf32> to vector<8x32xf32>
    %89 = vector.extract_strided_slice %77 {offsets = [0, 64], sizes = [8, 32], strides = [1, 1]} : vector<8x96xf32> to vector<8x32xf32>
    %90 = vector.extract_strided_slice %80 {offsets = [0, 64], sizes = [8, 32], strides = [1, 1]} : vector<8x96xf32> to vector<8x32xf32>
    %91 = arith.mulf %87, %90 : vector<8x32xf32>
    %92 = arith.addf %89, %91 : vector<8x32xf32>
    %93 = math.tanh %92 : vector<8x32xf32>
    %cst_24 = arith.constant 1.000000e+00 : f32
    %94 = vector.broadcast %cst_24 : f32 to vector<8x32xf32>
    %95 = arith.subf %94, %88 : vector<8x32xf32>
    %96 = arith.mulf %95, %93 : vector<8x32xf32>
    %97 = arith.mulf %88, %66 : vector<8x32xf32>
    %98 = arith.addf %96, %97 : vector<8x32xf32>
    %99 = arith.addi %8, %c2_i32 : i32
    %100 = vector.broadcast %99 : i32 to vector<8x1xi32>
    %101 = arith.cmpi slt, %100, %3 : vector<8x1xi32>
    %102 = arith.extui %101 : vector<8x1xi1> to vector<8x1xi32>
    %103 = arith.sitofp %102 : vector<8x1xi32> to vector<8x1xf32>
    %104 = vector.broadcast %103 : vector<8x1xf32> to vector<8x32xf32>
    %105 = arith.mulf %104, %98 : vector<8x32xf32>
    %106 = arith.addf %74, %105 : vector<8x32xf32>
    %c3_i32 = arith.constant 3 : i32
    %107 = arith.index_cast %c3_i32 : i32 to index
    %c0_25 = arith.constant 0 : index
    %c0_26 = arith.constant 0 : index
    %108 = vector.load %arg1[%107, %c0_25, %c0_26] : memref<8x8x96xf32, #tpu.memory_space<vmem>>, vector<1x8x96xf32>
    %109 = vector.shape_cast %108 : vector<1x8x96xf32> to vector<8x96xf32>
    %110 = arith.truncf %98 : vector<8x32xf32> to vector<8x32xbf16>
    %cst_27 = arith.constant dense<0.000000e+00> : vector<8x96xf32>
    %111 = tpu.matmul %110, %4, %cst_27 {dimension_numbers = #tpu.dot_dimension_numbers<[1], [0], [0], [1], [0, 0, 1, 1], [], []>} : vector<8x32xbf16>, vector<32x96xbf16>, vector<8x96xf32> -> vector<8x96xf32>
    %112 = arith.addf %111, %7 : vector<8x96xf32>
    %113 = arith.addf %109, %112 : vector<8x96xf32>
    %114 = arith.negf %113 : vector<8x96xf32>
    %115 = math.exp %114 : vector<8x96xf32>
    %cst_28 = arith.constant 1.000000e+00 : f32
    %116 = vector.broadcast %cst_28 : f32 to vector<8x96xf32>
    %117 = arith.addf %116, %115 : vector<8x96xf32>
    %118 = arith.divf %116, %117 : vector<8x96xf32>
    %119 = vector.extract_strided_slice %118 {offsets = [0, 0], sizes = [8, 32], strides = [1, 1]} : vector<8x96xf32> to vector<8x32xf32>
    %120 = vector.extract_strided_slice %118 {offsets = [0, 32], sizes = [8, 32], strides = [1, 1]} : vector<8x96xf32> to vector<8x32xf32>
    %121 = vector.extract_strided_slice %109 {offsets = [0, 64], sizes = [8, 32], strides = [1, 1]} : vector<8x96xf32> to vector<8x32xf32>
    %122 = vector.extract_strided_slice %112 {offsets = [0, 64], sizes = [8, 32], strides = [1, 1]} : vector<8x96xf32> to vector<8x32xf32>
    %123 = arith.mulf %119, %122 : vector<8x32xf32>
    %124 = arith.addf %121, %123 : vector<8x32xf32>
    %125 = math.tanh %124 : vector<8x32xf32>
    %cst_29 = arith.constant 1.000000e+00 : f32
    %126 = vector.broadcast %cst_29 : f32 to vector<8x32xf32>
    %127 = arith.subf %126, %120 : vector<8x32xf32>
    %128 = arith.mulf %127, %125 : vector<8x32xf32>
    %129 = arith.mulf %120, %98 : vector<8x32xf32>
    %130 = arith.addf %128, %129 : vector<8x32xf32>
    %131 = arith.addi %8, %c3_i32 : i32
    %132 = vector.broadcast %131 : i32 to vector<8x1xi32>
    %133 = arith.cmpi slt, %132, %3 : vector<8x1xi32>
    %134 = arith.extui %133 : vector<8x1xi1> to vector<8x1xi32>
    %135 = arith.sitofp %134 : vector<8x1xi32> to vector<8x1xf32>
    %136 = vector.broadcast %135 : vector<8x1xf32> to vector<8x32xf32>
    %137 = arith.mulf %136, %130 : vector<8x32xf32>
    %138 = arith.addf %106, %137 : vector<8x32xf32>
    %c4_i32 = arith.constant 4 : i32
    %139 = arith.index_cast %c4_i32 : i32 to index
    %c0_30 = arith.constant 0 : index
    %c0_31 = arith.constant 0 : index
    %140 = vector.load %arg1[%139, %c0_30, %c0_31] : memref<8x8x96xf32, #tpu.memory_space<vmem>>, vector<1x8x96xf32>
    %141 = vector.shape_cast %140 : vector<1x8x96xf32> to vector<8x96xf32>
    %142 = arith.truncf %130 : vector<8x32xf32> to vector<8x32xbf16>
    %cst_32 = arith.constant dense<0.000000e+00> : vector<8x96xf32>
    %143 = tpu.matmul %142, %4, %cst_32 {dimension_numbers = #tpu.dot_dimension_numbers<[1], [0], [0], [1], [0, 0, 1, 1], [], []>} : vector<8x32xbf16>, vector<32x96xbf16>, vector<8x96xf32> -> vector<8x96xf32>
    %144 = arith.addf %143, %7 : vector<8x96xf32>
    %145 = arith.addf %141, %144 : vector<8x96xf32>
    %146 = arith.negf %145 : vector<8x96xf32>
    %147 = math.exp %146 : vector<8x96xf32>
    %cst_33 = arith.constant 1.000000e+00 : f32
    %148 = vector.broadcast %cst_33 : f32 to vector<8x96xf32>
    %149 = arith.addf %148, %147 : vector<8x96xf32>
    %150 = arith.divf %148, %149 : vector<8x96xf32>
    %151 = vector.extract_strided_slice %150 {offsets = [0, 0], sizes = [8, 32], strides = [1, 1]} : vector<8x96xf32> to vector<8x32xf32>
    %152 = vector.extract_strided_slice %150 {offsets = [0, 32], sizes = [8, 32], strides = [1, 1]} : vector<8x96xf32> to vector<8x32xf32>
    %153 = vector.extract_strided_slice %141 {offsets = [0, 64], sizes = [8, 32], strides = [1, 1]} : vector<8x96xf32> to vector<8x32xf32>
    %154 = vector.extract_strided_slice %144 {offsets = [0, 64], sizes = [8, 32], strides = [1, 1]} : vector<8x96xf32> to vector<8x32xf32>
    %155 = arith.mulf %151, %154 : vector<8x32xf32>
    %156 = arith.addf %153, %155 : vector<8x32xf32>
    %157 = math.tanh %156 : vector<8x32xf32>
    %cst_34 = arith.constant 1.000000e+00 : f32
    %158 = vector.broadcast %cst_34 : f32 to vector<8x32xf32>
    %159 = arith.subf %158, %152 : vector<8x32xf32>
    %160 = arith.mulf %159, %157 : vector<8x32xf32>
    %161 = arith.mulf %152, %130 : vector<8x32xf32>
    %162 = arith.addf %160, %161 : vector<8x32xf32>
    %163 = arith.addi %8, %c4_i32 : i32
    %164 = vector.broadcast %163 : i32 to vector<8x1xi32>
    %165 = arith.cmpi slt, %164, %3 : vector<8x1xi32>
    %166 = arith.extui %165 : vector<8x1xi1> to vector<8x1xi32>
    %167 = arith.sitofp %166 : vector<8x1xi32> to vector<8x1xf32>
    %168 = vector.broadcast %167 : vector<8x1xf32> to vector<8x32xf32>
    %169 = arith.mulf %168, %162 : vector<8x32xf32>
    %170 = arith.addf %138, %169 : vector<8x32xf32>
    %c5_i32 = arith.constant 5 : i32
    %171 = arith.index_cast %c5_i32 : i32 to index
    %c0_35 = arith.constant 0 : index
    %c0_36 = arith.constant 0 : index
    %172 = vector.load %arg1[%171, %c0_35, %c0_36] : memref<8x8x96xf32, #tpu.memory_space<vmem>>, vector<1x8x96xf32>
    %173 = vector.shape_cast %172 : vector<1x8x96xf32> to vector<8x96xf32>
    %174 = arith.truncf %162 : vector<8x32xf32> to vector<8x32xbf16>
    %cst_37 = arith.constant dense<0.000000e+00> : vector<8x96xf32>
    %175 = tpu.matmul %174, %4, %cst_37 {dimension_numbers = #tpu.dot_dimension_numbers<[1], [0], [0], [1], [0, 0, 1, 1], [], []>} : vector<8x32xbf16>, vector<32x96xbf16>, vector<8x96xf32> -> vector<8x96xf32>
    %176 = arith.addf %175, %7 : vector<8x96xf32>
    %177 = arith.addf %173, %176 : vector<8x96xf32>
    %178 = arith.negf %177 : vector<8x96xf32>
    %179 = math.exp %178 : vector<8x96xf32>
    %cst_38 = arith.constant 1.000000e+00 : f32
    %180 = vector.broadcast %cst_38 : f32 to vector<8x96xf32>
    %181 = arith.addf %180, %179 : vector<8x96xf32>
    %182 = arith.divf %180, %181 : vector<8x96xf32>
    %183 = vector.extract_strided_slice %182 {offsets = [0, 0], sizes = [8, 32], strides = [1, 1]} : vector<8x96xf32> to vector<8x32xf32>
    %184 = vector.extract_strided_slice %182 {offsets = [0, 32], sizes = [8, 32], strides = [1, 1]} : vector<8x96xf32> to vector<8x32xf32>
    %185 = vector.extract_strided_slice %173 {offsets = [0, 64], sizes = [8, 32], strides = [1, 1]} : vector<8x96xf32> to vector<8x32xf32>
    %186 = vector.extract_strided_slice %176 {offsets = [0, 64], sizes = [8, 32], strides = [1, 1]} : vector<8x96xf32> to vector<8x32xf32>
    %187 = arith.mulf %183, %186 : vector<8x32xf32>
    %188 = arith.addf %185, %187 : vector<8x32xf32>
    %189 = math.tanh %188 : vector<8x32xf32>
    %cst_39 = arith.constant 1.000000e+00 : f32
    %190 = vector.broadcast %cst_39 : f32 to vector<8x32xf32>
    %191 = arith.subf %190, %184 : vector<8x32xf32>
    %192 = arith.mulf %191, %189 : vector<8x32xf32>
    %193 = arith.mulf %184, %162 : vector<8x32xf32>
    %194 = arith.addf %192, %193 : vector<8x32xf32>
    %195 = arith.addi %8, %c5_i32 : i32
    %196 = vector.broadcast %195 : i32 to vector<8x1xi32>
    %197 = arith.cmpi slt, %196, %3 : vector<8x1xi32>
    %198 = arith.extui %197 : vector<8x1xi1> to vector<8x1xi32>
    %199 = arith.sitofp %198 : vector<8x1xi32> to vector<8x1xf32>
    %200 = vector.broadcast %199 : vector<8x1xf32> to vector<8x32xf32>
    %201 = arith.mulf %200, %194 : vector<8x32xf32>
    %202 = arith.addf %170, %201 : vector<8x32xf32>
    %c6_i32 = arith.constant 6 : i32
    %203 = arith.index_cast %c6_i32 : i32 to index
    %c0_40 = arith.constant 0 : index
    %c0_41 = arith.constant 0 : index
    %204 = vector.load %arg1[%203, %c0_40, %c0_41] : memref<8x8x96xf32, #tpu.memory_space<vmem>>, vector<1x8x96xf32>
    %205 = vector.shape_cast %204 : vector<1x8x96xf32> to vector<8x96xf32>
    %206 = arith.truncf %194 : vector<8x32xf32> to vector<8x32xbf16>
    %cst_42 = arith.constant dense<0.000000e+00> : vector<8x96xf32>
    %207 = tpu.matmul %206, %4, %cst_42 {dimension_numbers = #tpu.dot_dimension_numbers<[1], [0], [0], [1], [0, 0, 1, 1], [], []>} : vector<8x32xbf16>, vector<32x96xbf16>, vector<8x96xf32> -> vector<8x96xf32>
    %208 = arith.addf %207, %7 : vector<8x96xf32>
    %209 = arith.addf %205, %208 : vector<8x96xf32>
    %210 = arith.negf %209 : vector<8x96xf32>
    %211 = math.exp %210 : vector<8x96xf32>
    %cst_43 = arith.constant 1.000000e+00 : f32
    %212 = vector.broadcast %cst_43 : f32 to vector<8x96xf32>
    %213 = arith.addf %212, %211 : vector<8x96xf32>
    %214 = arith.divf %212, %213 : vector<8x96xf32>
    %215 = vector.extract_strided_slice %214 {offsets = [0, 0], sizes = [8, 32], strides = [1, 1]} : vector<8x96xf32> to vector<8x32xf32>
    %216 = vector.extract_strided_slice %214 {offsets = [0, 32], sizes = [8, 32], strides = [1, 1]} : vector<8x96xf32> to vector<8x32xf32>
    %217 = vector.extract_strided_slice %205 {offsets = [0, 64], sizes = [8, 32], strides = [1, 1]} : vector<8x96xf32> to vector<8x32xf32>
    %218 = vector.extract_strided_slice %208 {offsets = [0, 64], sizes = [8, 32], strides = [1, 1]} : vector<8x96xf32> to vector<8x32xf32>
    %219 = arith.mulf %215, %218 : vector<8x32xf32>
    %220 = arith.addf %217, %219 : vector<8x32xf32>
    %221 = math.tanh %220 : vector<8x32xf32>
    %cst_44 = arith.constant 1.000000e+00 : f32
    %222 = vector.broadcast %cst_44 : f32 to vector<8x32xf32>
    %223 = arith.subf %222, %216 : vector<8x32xf32>
    %224 = arith.mulf %223, %221 : vector<8x32xf32>
    %225 = arith.mulf %216, %194 : vector<8x32xf32>
    %226 = arith.addf %224, %225 : vector<8x32xf32>
    %227 = arith.addi %8, %c6_i32 : i32
    %228 = vector.broadcast %227 : i32 to vector<8x1xi32>
    %229 = arith.cmpi slt, %228, %3 : vector<8x1xi32>
    %230 = arith.extui %229 : vector<8x1xi1> to vector<8x1xi32>
    %231 = arith.sitofp %230 : vector<8x1xi32> to vector<8x1xf32>
    %232 = vector.broadcast %231 : vector<8x1xf32> to vector<8x32xf32>
    %233 = arith.mulf %232, %226 : vector<8x32xf32>
    %234 = arith.addf %202, %233 : vector<8x32xf32>
    %c7_i32 = arith.constant 7 : i32
    %235 = arith.index_cast %c7_i32 : i32 to index
    %c0_45 = arith.constant 0 : index
    %c0_46 = arith.constant 0 : index
    %236 = vector.load %arg1[%235, %c0_45, %c0_46] : memref<8x8x96xf32, #tpu.memory_space<vmem>>, vector<1x8x96xf32>
    %237 = vector.shape_cast %236 : vector<1x8x96xf32> to vector<8x96xf32>
    %238 = arith.truncf %226 : vector<8x32xf32> to vector<8x32xbf16>
    %cst_47 = arith.constant dense<0.000000e+00> : vector<8x96xf32>
    %239 = tpu.matmul %238, %4, %cst_47 {dimension_numbers = #tpu.dot_dimension_numbers<[1], [0], [0], [1], [0, 0, 1, 1], [], []>} : vector<8x32xbf16>, vector<32x96xbf16>, vector<8x96xf32> -> vector<8x96xf32>
    %240 = arith.addf %239, %7 : vector<8x96xf32>
    %241 = arith.addf %237, %240 : vector<8x96xf32>
    %242 = arith.negf %241 : vector<8x96xf32>
    %243 = math.exp %242 : vector<8x96xf32>
    %cst_48 = arith.constant 1.000000e+00 : f32
    %244 = vector.broadcast %cst_48 : f32 to vector<8x96xf32>
    %245 = arith.addf %244, %243 : vector<8x96xf32>
    %246 = arith.divf %244, %245 : vector<8x96xf32>
    %247 = vector.extract_strided_slice %246 {offsets = [0, 0], sizes = [8, 32], strides = [1, 1]} : vector<8x96xf32> to vector<8x32xf32>
    %248 = vector.extract_strided_slice %246 {offsets = [0, 32], sizes = [8, 32], strides = [1, 1]} : vector<8x96xf32> to vector<8x32xf32>
    %249 = vector.extract_strided_slice %237 {offsets = [0, 64], sizes = [8, 32], strides = [1, 1]} : vector<8x96xf32> to vector<8x32xf32>
    %250 = vector.extract_strided_slice %240 {offsets = [0, 64], sizes = [8, 32], strides = [1, 1]} : vector<8x96xf32> to vector<8x32xf32>
    %251 = arith.mulf %247, %250 : vector<8x32xf32>
    %252 = arith.addf %249, %251 : vector<8x32xf32>
    %253 = math.tanh %252 : vector<8x32xf32>
    %cst_49 = arith.constant 1.000000e+00 : f32
    %254 = vector.broadcast %cst_49 : f32 to vector<8x32xf32>
    %255 = arith.subf %254, %248 : vector<8x32xf32>
    %256 = arith.mulf %255, %253 : vector<8x32xf32>
    %257 = arith.mulf %248, %226 : vector<8x32xf32>
    %258 = arith.addf %256, %257 : vector<8x32xf32>
    %259 = arith.addi %8, %c7_i32 : i32
    %260 = vector.broadcast %259 : i32 to vector<8x1xi32>
    %261 = arith.cmpi slt, %260, %3 : vector<8x1xi32>
    %262 = arith.extui %261 : vector<8x1xi1> to vector<8x1xi32>
    %263 = arith.sitofp %262 : vector<8x1xi32> to vector<8x1xf32>
    %264 = vector.broadcast %263 : vector<8x1xf32> to vector<8x32xf32>
    %265 = arith.mulf %264, %258 : vector<8x32xf32>
    %266 = arith.addf %234, %265 : vector<8x32xf32>
    %c8_i32_50 = arith.constant 8 : i32
    %c0_51 = arith.constant 0 : index
    %c0_52 = arith.constant 0 : index
    %267 = vector.load %arg6[%c0_51, %c0_52] : memref<8x32xf32, #tpu.memory_space<vmem>>, vector<8x32xf32>
    tpu.vector_store %arg6[%c0_51, %c0_52], %258 {strides = array<i32>} : memref<8x32xf32, #tpu.memory_space<vmem>>, vector<8x32xf32>,
    %c0_53 = arith.constant 0 : index
    %c0_54 = arith.constant 0 : index
    %268 = vector.load %arg5[%c0_53, %c0_54] : memref<8x32xf32, #tpu.memory_space<vmem>>, vector<8x32xf32>
    tpu.vector_store %arg5[%c0_53, %c0_54], %266 {strides = array<i32>} : memref<8x32xf32, #tpu.memory_space<vmem>>, vector<8x32xf32>,
    return
  }
  func.func @transform_0(%arg0: i32) -> (i32, i32, i32) {
    %c0_i32 = arith.constant 0 : i32
    %c0_i32_0 = arith.constant 0 : i32
    %c0_i32_1 = arith.constant 0 : i32
    return %arg0, %c0_i32, %c0_i32_0 : i32, i32, i32
  }
  func.func @transform_1(%arg0: i32) -> (i32, i32) {
    %c0_i32 = arith.constant 0 : i32
    %c0_i32_0 = arith.constant 0 : i32
    %c0_i32_1 = arith.constant 0 : i32
    return %c0_i32, %c0_i32_0 : i32, i32
  }
  func.func @transform_2(%arg0: i32) -> (i32, i32) {
    %c0_i32 = arith.constant 0 : i32
    %c0_i32_0 = arith.constant 0 : i32
    %c0_i32_1 = arith.constant 0 : i32
    return %c0_i32, %c0_i32_0 : i32, i32
  }
  func.func @transform_3(%arg0: i32) -> (i32, i32) {
    %c0_i32 = arith.constant 0 : i32
    %c0_i32_0 = arith.constant 0 : i32
    %c0_i32_1 = arith.constant 0 : i32
    return %c0_i32, %c0_i32_0 : i32, i32
  }
  func.func @transform_4(%arg0: i32) -> (i32, i32) {
    %c0_i32 = arith.constant 0 : i32
    %c0_i32_0 = arith.constant 0 : i32
    %c0_i32_1 = arith.constant 0 : i32
    return %c0_i32, %c0_i32_0 : i32, i32
  }
}

</mosaic_0001>

<bundles_post_ra>
// kernel: tpu_custom_call.1
= control target key start
LH: loop header
LB: loop body
LE: loop exit
PB: predicated region body
PF: predicated region fallthrough
CT: control target
= control target key end

     0   :  { %9 = vsyncpa [#allocation4], 0  ;;  %s1729_s0 = inlined_call_operand.hbm [shape: f32[16,8,96], index: 0, kind: input, shape index: {}]   ;;  %s1730_s1 = inlined_call_operand.vmem [shape: s32[8,1], index: 1, kind: input, shape index: {}]   ;;  %s1731_s2 = inlined_call_operand.vmem [shape: bf16[32,96], index: 2, kind: input, shape index: {}]   ;;  %s1732_s3 = inlined_call_operand.vmem [shape: f32[1,96], index: 3, kind: input, shape index: {}]   ;;  %s1733_s4 = inlined_call_operand.hbm [shape: f32[8,32], index: 4, kind: output, shape index: {}]  }
   0x1   :  { %11 = vsyncpa [#allocation4 + $0x1], 0 }
   0x2   :  { %12 = vsyncpa [#allocation5], 0  ;;  %s1407_s15 = smov 0   ;;  %s1409_s16 = smov 0  }
   0x3   :  { %s1411_s17 = smov 0   ;;  %s1413_s18 = smov 0  }
   0x4 LB: > { %s1426_s19 = sadd.s32 4294967295, %s1369_s18   ;;  %s1429_s20 = sadd.s32 1, %s1369_s18   ;;  %s1369_s18 = sphi %s1413_s18, %s1740_s18   ;;  %s1365_s17 = sphi %s1411_s17, %s1739_s17   ;;  %s1361_s16 = sphi %s1409_s16, %s1738_s16   ;;  %s1357_s15 = sphi %s1407_s15, %s1737_s15  }
   0x5   : > { %s22_s21 = ssub.s32 %s1369_s18, %s1429_s20  ;;  %s25_s22 = sadd.s32 1, %s1365_s17 }
   0x6   : > { %p23_p0 = scmp.eq.s32.totalorder %s22_s21, 0  ;;  %p32_p1 = scmp.ne.s32.totalorder %s1365_s17, %s1361_s16 }
   0x7   : > { %p33_p2 = scmp.eq.s32.totalorder %s1369_s18, 0  ;;  %p38_p3 = scmp.ne.s32.totalorder %s1361_s16, %s1357_s15 }
   0x8   : > { %s1439_s23 = scalar_select %p23_p0, %s1365_s17, %s25_s22  }
   0x9   : > { %p34_p4 = por %p33_p2, %p32_p1  ;;  %p39_p5 = scmp.eq.s32.totalorder %s1426_s19, 0 }
   0xa   : > { %p1178_p6 = scmp.lt.s32.totalorder %s1369_s18, 2  ;;  %s155_s25 = sand.u32 1, %s1365_s17  }
   0xb   : > { %p1443_p7 = por %p39_p5, %p38_p3  ;;  %s1034_s26 = sshll.u32 %s155_s25, 6 }
   0xc   : > { %s1079_s27 = sshll.u32 %s1369_s18, 10  ;;  %s159_s5 = scalar_lea.vmem [#allocation3], %s1034_s26 }
   0xd   : > { %s1452_s30 = scalar_lea.hbm %s1729_s0, %s1079_s27  ;;  %s166_s6 = sshll.u32 %s159_s5, 4  ;;  %s1454_s6 = int_to_ptr.vmem [resolvable:$true] %s166_s6 }
   0xe   : > { %p1456_p8 = pnand %p1178_p6, %p34_p4  ;;  %s1461_s8 = scalar_lea.sflag [#allocation4], %s155_s25 }
   0xf   : > { %s1275_s9 = scalar_lea.hbm %s1452_s30, 1024  ;;  %s1280_s12 = scalar_lea.hbm %s1729_s0, 2048 }
  0x10   : > { %p1276_p10 = scmp.ne.s32.totalorder %s1452_s30, %s1275_s9  ;;  %p1277_p11 = pneg %p1456_p8 }
  0x11   : > { %p1281_p0 = scmp.lt.u32.totalorder %s1452_s30, %s1729_s0  ;;  %p1282_p1 = scmp.lt.u32.totalorder %s1280_s12, %s1275_s9 }
  0x12   : > { %p1278_p12 = pnand %p1277_p11, %p1276_p10  ;;  %p1284_p3 = scmp.lt.u32.totalorder %s1275_s9, %s1452_s30 }
  0x13   : > { %p1283_p2 = por %p1282_p1, %p1281_p0 }
  0x14   : > { %p1279_p13 = pneg %p1278_p12 }
  0x15   : > { %p1285_p4 = por %p1284_p3, %p1283_p2 }
  0x17   : > { %p1286_p5 = pnand %p1285_p4, %p1279_p13 }
  0x19   : > { %1289 = shalt.err (!%p1286_p5)
}
  0x1a   : > { %s1290_s15 = scalar_lea.vmem %s1454_s6, 1024  ;;  %s1371_s21 = smov [#allocation3]  }
  0x1b   : > { %p1291_p6 = scmp.ne.s32.totalorder %s1454_s6, %s1290_s15  ;;  %s1295_s22 = sshll.u32 %s1371_s21, 4  ;;  %s1296_s22 = int_to_ptr.vmem [resolvable:$false] %s1295_s22 }
  0x1c   : > { %s1297_s25 = scalar_lea.vmem %s1296_s22, 2048  ;;  %p1298_p9 = scmp.lt.s32.totalorder %s1454_s6, %s1296_s22 }
  0x1d   : > { %p1293_p10 = pnand %p1291_p6, %p1277_p11  ;;  %p1299_p0 = scmp.lt.s32.totalorder %s1297_s25, %s1290_s15 }
  0x1f   : > { %p1294_p12 = pneg %p1293_p10  ;;  %p1300_p1 = por %p1299_p0, %p1298_p9 }
  0x21   : > { %p1301_p2 = pnand %p1300_p1, %p1294_p12 }
  0x23   : > { %1304 = shalt.err (!%p1301_p2)
}
  0x24   : > { %s1372_s26 = smov 128   ;;  %s1373_s27 = smov 8  }
  0x25   : > { %1177 = dma.hbm_to_vmem [thread:$0]  (!%p1456_p8), %s1452_s30, 1024, %s1454_s6, %s1461_s8, %s1372_s26, %s1372_s26, %s1373_s27  }
  0x26   : > { %p174_p11 = scmp.lt.s32.totalorder %s1369_s18, 3  ;;  %p1736_p13 = scmp.ge.s32.totalorder %s1369_s18, 1 }
  0x28   : > { %p175_p3 = pnand %p1736_p13, %p174_p11 }
  0x29   : > { %s180_s28 = sand.u32 (!%p175_p3), 1, %s1361_s16  }
  0x2a   : > { %178 = sbr.rel (%p175_p3) target bundleno = 5649 (0x1611), region = 36  ;;  %s1038_s29 = sshll.u32 (!%p175_p3), %s180_s28, 6 }
  0x2b   : > { %s181_s5 = scalar_lea.sflag (!%p175_p3), [#allocation4], %s180_s28  ;;  %s1493_s9 = scalar_lea.vmem (!%p175_p3), [#allocation3], %s1038_s29 }
  0x31   : > { %1348 = dma.done.wait (%p1443_p7), %s181_s5, 1024  }
  0x32   : > { %1350 = vsyncadd (%p1443_p7), %s181_s5, 4294966272  ;;  %p1039_p9 = scmp.ne.s32.totalorder %s1426_s19, 0 }
  0x33   : > { %vm210_vm0 = vcmask (!%p1039_p9), 261120   ;;  %v1374_v0 = vmov (!%p1039_p9), 0.0  }
  0x34   : > { %209 = sbr.rel (%p1039_p9) target bundleno = 59 (0x3b), region = 44  ;;  %211 = vst.msk [vmem:[#allocation2] sm:$0xff] (!%p1039_p9), %vm210_vm0, %v1374_v0  ;;  %212 = vst.msk [vmem:[#allocation6] sm:$0xff] (!%p1039_p9), %vm210_vm0, %v1374_v0 }
  0x3b PF: > { %v1503_v1 = vld [vmem:[%s1731_s2] sm:$0xff]   ;;  %v1375_v2 = vmov 0.0   ;;  %v1511_v3 = vld [vmem:[%s1731_s2 + $0x8] sm:$0xff]   ;;  %vm1376_vm1 = vmmov 0   ;;  %vm242_vm2 = vcmask 261120   ;;  %s1377_s10 = smov 64  }
  0x3c   : > { %1104 = vmatprep.subr.bf16.mxu0 %v1375_v2  ;;  %1112 = vmatprep.subr.bf16.mxu1 %v1375_v2  ;;  %v226_v4 = vld [vmem:[#allocation2] sm:$0xff]  ;;  %v228_v12 = vld [vmem:[%s1493_s9] sm:$0xff]  ;;  %s1378_s11 = smov 96   ;;  %s1379_s12 = smov 32   ;;  %v1047_v36 = vld [vmem:[%s1493_s9 + $0x8] sm:$0xff] }
  0x3d   : > { %1105 = vmatpush3.bf16.msra.mxu0 %v1503_v1  ;;  %1108 = vmatprep.mubr.msk.bf16.mxu0 %vm1376_vm1, %v1375_v2  ;;  %v229_v5 = vpack.c.bf16 %v226_v4, %v226_v4  ;;  %v1534_v6 = vld [vmem:[%s1732_s3] ss:$0 sm:$0xff]  ;;  %v1051_v59 = vld [vmem:[%s1493_s9 + $0x10] sm:$0xff]  ;;  %s1648_s13 = sshll.u32 %s1426_s19, 3  ;;  %s1381_s5 = smov [#allocation6]  }
  0x3e   : > { %1106 = vmatprep.subr.bf16.mxu0 %v1375_v2  ;;  %1113 = vmatpush3.bf16.msra.mxu1 %v1503_v1  ;;  %s497_s21 = sadd.s32 2, %s1648_s13  ;;  %s588_s22 = sadd.s32 3, %s1648_s13 }
  0x3f   : > { %1114 = vmatprep.subr.bf16.mxu1 %v1375_v2  ;;  %1116 = vmatprep.mubr.msk.bf16.mxu1 %vm1376_vm1, %v1375_v2  ;;  %s770_s25 = sadd.s32 5, %s1648_s13  ;;  %s952_s26 = sadd.s32 7, %s1648_s13 }
  0x40   : > { %s406_s27 = sadd.s32 1, %s1648_s13  ;;  %s679_s28 = sadd.s32 4, %s1648_s13 }
  0x41   : > { %1107 = vmatpush3.bf16.msra.mxu0 %v1511_v3  ;;  %s861_s29 = sadd.s32 6, %s1648_s13  ;;  %p1179_p7 = scmp.eq.s32.totalorder %s1426_s19, 1 }
  0x42   : > { %1115 = vmatpush3.bf16.msra.mxu1 %v1511_v3  ;;  %1120 = vmatprep.subr.bf16.mxu0 %v1375_v2 }
  0x43   : > { %1128 = vmatprep.subr.bf16.mxu1 %v1375_v2 }
  0x44   : > { %1109 = vmatmul.mubr.msk.bf16.vlgmr.msra.gmra.mrb[0].mxu0 %vm242_vm2, %v229_v5 }
  0x45   : > { %1121 = vmatpush3.bf16.msra.mxu0 %v1503_v1  ;;  %1124 = vmatprep.mubr.msk.bf16.mxu0 %vm1376_vm1, %v1375_v2 }
  0x46   : > { %1122 = vmatprep.subr.bf16.mxu0 %v1375_v2 }
  0x49   : > { %1123 = vmatpush3.bf16.msra.mxu0 %v1511_v3 }
  0x4a   : > { %1136 = vmatprep.subr.bf16.mxu0 %v1375_v2 }
 0x117   : > { %v280_v7 = vpop.f32.mrb[0].mxu0 }
 0x118   : > { %v281_v8 = vadd.f32 %v1534_v6, %v280_v7  ;;  %v1110_v9 = vpop.f32.mrb[1].mxu0 }
 0x119   : > { %v283_v10 = vpop.f32.mrb[2].mxu0 }
 0x11a   : > { %294 = vrot.lane.b32.xlu0 %v281_v8, %s1377_s10  ;;  %v1111_v11 = vpop.f32.mrb[3].mxu0  ;;  %v286_v13 = vadd.f32 %v281_v8, %v228_v12 }
 0x11c   : > { %v1045_v14 = vmul.f32 -1.442695, %v286_v13 }
 0x11e   : > { %1227 = vpow2.f32 %v1045_v14 }
 0x128   : > { %v1228_v15 = vpop.eup %1227 }
 0x129   : > { %v290_v16 = vadd.f32 1.0, %v1228_v15 }
 0x12b   : > { %1229 = vrcp.f32 %v290_v16 }
 0x135   : > { %v1230_v17 = vpop.eup %1229 }
 0x136   : > { %v304_v24 = vsub.f32 1.0, %v1230_v17 }
 0x18c   : > { %v295_v18 = vpop.permute.xlu0 %294 }
 0x18d   : > { %v297_v19 = vmul.f32 %v1230_v17, %v295_v18 }
 0x18f   : > { %299 = vrot.lane.b32.xlu0 %v297_v19, %s1377_s10 }
 0x201   : > { %v300_v20 = vpop.permute.xlu0 %299 }
 0x202   : > { %v302_v21 = vadd.f32 %v300_v20, %v228_v12 }
 0x204   : > { %1231 = vtanh.f32 %v302_v21 }
 0x20e   : > { %v1232_v22 = vpop.eup %1231 }
 0x20f   : > { %306 = vrot.lane.b32.xlu1 %v1232_v22, %s1378_s11  ;;  %v1055_v22 = vld [vmem:[%s1493_s9 + $0x18] sm:$0xff] }
 0x213   : > { %311 = vrot.lane.b32.xlu1 %v226_v4, %s1379_s12 }
 0x281   : > { %v307_v23 = vpop.permute.xlu1 %306 }
 0x282   : > { %v309_v26 = vmul.f32 %v307_v23, %v304_v24 }
 0x285   : > { %v312_v25 = vpop.permute.xlu1 %311 }
 0x286   : > { %v314_v27 = vmul.f32 %v1230_v17, %v312_v25 }
 0x288   : > { %v1541_v28 = vadd.f32 %v314_v27, %v309_v26 }
 0x28a   : > { %v333_v29 = vpack.c.bf16 %v1541_v28, %v1541_v28 }
 0x28c   : > { %335 = vrot.lane.b32.xlu0 %v333_v29, %s1378_s11 }
 0x2fe   : > { %v336_v30 = vpop.permute.xlu0 %335 }
 0x2ff   : > { %1117 = vmatmul.mubr.msk.bf16.vlgmr.msra.gmra.mrb[0].mxu1 %vm242_vm2, %v336_v30 }
 0x300   : > { %1129 = vmatpush3.bf16.msra.mxu1 %v1503_v1  ;;  %1132 = vmatprep.mubr.msk.bf16.mxu1 %vm1376_vm1, %v1375_v2 }
 0x301   : > { %1130 = vmatprep.subr.bf16.mxu1 %v1375_v2 }
 0x304   : > { %1131 = vmatpush3.bf16.msra.mxu1 %v1511_v3 }
 0x305   : > { %1144 = vmatprep.subr.bf16.mxu1 %v1375_v2 }
 0x3d2   : > { %v374_v31 = vpop.f32.mrb[0].mxu1 }
 0x3d3   : > { %v375_v32 = vadd.f32 %v1534_v6, %v374_v31  ;;  %v1118_v33 = vpop.f32.mrb[1].mxu1 }
 0x3d4   : > { %v377_v34 = vpop.f32.mrb[2].mxu1 }
 0x3d5   : > { %388 = vrot.lane.b32.xlu1 %v375_v32, %s1377_s10  ;;  %v1119_v35 = vpop.f32.mrb[3].mxu1  ;;  %v380_v37 = vadd.f32 %v1047_v36, %v375_v32 }
 0x3d7   : > { %v1049_v38 = vmul.f32 -1.442695, %v380_v37 }
 0x3d9   : > { %1233 = vpow2.f32 %v1049_v38 }
 0x3e3   : > { %v1234_v39 = vpop.eup %1233 }
 0x3e4   : > { %v384_v40 = vadd.f32 1.0, %v1234_v39 }
 0x3e6   : > { %1235 = vrcp.f32 %v384_v40 }
 0x3f0   : > { %v1236_v41 = vpop.eup %1235 }
 0x3f1   : > { %v398_v47 = vsub.f32 1.0, %v1236_v41  ;;  %v404_v49 = vmul.f32 %v1236_v41, %v1541_v28 }
 0x447   : > { %v389_v42 = vpop.permute.xlu1 %388 }
 0x448   : > { %v391_v43 = vmul.f32 %v1236_v41, %v389_v42 }
 0x44a   : > { %393 = vrot.lane.b32.xlu0 %v391_v43, %s1377_s10 }
 0x4bc   : > { %v394_v44 = vpop.permute.xlu0 %393 }
 0x4bd   : > { %v396_v45 = vadd.f32 %v1047_v36, %v394_v44 }
 0x4bf   : > { %1237 = vtanh.f32 %v396_v45 }
 0x4c9   : > { %v1238_v46 = vpop.eup %1237 }
 0x4ca   : > { %400 = vrot.lane.b32.xlu1 %v1238_v46, %s1378_s11  ;;  %v1059_v46 = vld [vmem:[%s1493_s9 + $0x20] sm:$0xff] }
 0x53c   : > { %v401_v48 = vpop.permute.xlu1 %400 }
 0x53d   : > { %v403_v50 = vmul.f32 %v401_v48, %v398_v47 }
 0x53f   : > { %v1559_v51 = vadd.f32 %v404_v49, %v403_v50 }
 0x541   : > { %v424_v52 = vpack.c.bf16 %v1559_v51, %v1559_v51 }
 0x543   : > { %426 = vrot.lane.b32.xlu0 %v424_v52, %s1378_s11 }
 0x5b5   : > { %v427_v53 = vpop.permute.xlu0 %426 }
 0x5b6   : > { %1125 = vmatmul.mubr.msk.bf16.vlgmr.msra.gmra.mrb[4].mxu0 %vm242_vm2, %v427_v53 }
 0x5b7   : > { %1137 = vmatpush3.bf16.msra.mxu0 %v1503_v1  ;;  %1140 = vmatprep.mubr.msk.bf16.mxu0 %vm1376_vm1, %v1375_v2 }
 0x5b8   : > { %1138 = vmatprep.subr.bf16.mxu0 %v1375_v2 }
 0x5bb   : > { %1139 = vmatpush3.bf16.msra.mxu0 %v1511_v3 }
 0x5bc   : > { %1152 = vmatprep.subr.bf16.mxu0 %v1375_v2 }
 0x689   : > { %v465_v54 = vpop.f32.mrb[4].mxu0 }
 0x68a   : > { %v466_v55 = vadd.f32 %v1534_v6, %v465_v54  ;;  %v1126_v56 = vpop.f32.mrb[5].mxu0 }
 0x68b   : > { %v468_v57 = vpop.f32.mrb[6].mxu0 }
 0x68c   : > { %479 = vrot.lane.b32.xlu1 %v466_v55, %s1377_s10  ;;  %v1127_v58 = vpop.f32.mrb[7].mxu0  ;;  %v471_v60 = vadd.f32 %v1051_v59, %v466_v55 }
 0x68e   : > { %v1053_v61 = vmul.f32 -1.442695, %v471_v60 }
 0x690   : > { %1239 = vpow2.f32 %v1053_v61 }
 0x69a   : > { %v1240_v62 = vpop.eup %1239 }
 0x69b   : > { %v475_v63 = vadd.f32 1.0, %v1240_v62 }
 0x69d   : > { %1241 = vrcp.f32 %v475_v63 }
 0x6a7   : > { %v1242_v0 = vpop.eup %1241 }
 0x6a8   : > { %v489_v10 = vsub.f32 1.0, %v1242_v0  ;;  %v495_v12 = vmul.f32 %v1242_v0, %v1559_v51 }
 0x6fe   : > { %v480_v4 = vpop.permute.xlu1 %479 }
 0x6ff   : > { %v482_v5 = vmul.f32 %v1242_v0, %v480_v4 }
 0x701   : > { %484 = vrot.lane.b32.xlu0 %v482_v5, %s1377_s10 }
 0x773   : > { %v485_v7 = vpop.permute.xlu0 %484 }
 0x774   : > { %v487_v8 = vadd.f32 %v1051_v59, %v485_v7 }
 0x776   : > { %1243 = vtanh.f32 %v487_v8 }
 0x780   : > { %v1244_v9 = vpop.eup %1243 }
 0x781   : > { %491 = vrot.lane.b32.xlu1 %v1244_v9, %s1378_s11 }
 0x7f3   : > { %v492_v11 = vpop.permute.xlu1 %491 }
 0x7f4   : > { %v494_v13 = vmul.f32 %v492_v11, %v489_v10  ;;  %v1063_v10 = vld [vmem:[%s1493_s9 + $0x28] sm:$0xff] }
 0x7f6   : > { %v1577_v14 = vadd.f32 %v495_v12, %v494_v13 }
 0x7f8   : > { %v515_v15 = vpack.c.bf16 %v1577_v14, %v1577_v14 }
 0x7fa   : > { %517 = vrot.lane.b32.xlu0 %v515_v15, %s1378_s11 }
 0x86c   : > { %v518_v16 = vpop.permute.xlu0 %517 }
 0x86d   : > { %1133 = vmatmul.mubr.msk.bf16.vlgmr.msra.gmra.mrb[4].mxu1 %vm242_vm2, %v518_v16 }
 0x86e   : > { %1145 = vmatpush3.bf16.msra.mxu1 %v1503_v1  ;;  %1148 = vmatprep.mubr.msk.bf16.mxu1 %vm1376_vm1, %v1375_v2 }
 0x86f   : > { %1146 = vmatprep.subr.bf16.mxu1 %v1375_v2 }
 0x872   : > { %1147 = vmatpush3.bf16.msra.mxu1 %v1511_v3 }
 0x873   : > { %1160 = vmatprep.subr.bf16.mxu1 %v1375_v2 }
 0x940   : > { %v556_v17 = vpop.f32.mrb[4].mxu1 }
 0x941   : > { %v557_v18 = vadd.f32 %v1534_v6, %v556_v17  ;;  %v1134_v19 = vpop.f32.mrb[5].mxu1 }
 0x942   : > { %v559_v20 = vpop.f32.mrb[6].mxu1 }
 0x943   : > { %570 = vrot.lane.b32.xlu1 %v557_v18, %s1377_s10  ;;  %v1135_v21 = vpop.f32.mrb[7].mxu1  ;;  %v562_v23 = vadd.f32 %v1055_v22, %v557_v18 }
 0x945   : > { %v1057_v24 = vmul.f32 -1.442695, %v562_v23 }
 0x947   : > { %1245 = vpow2.f32 %v1057_v24 }
 0x951   : > { %v1246_v25 = vpop.eup %1245 }
 0x952   : > { %v566_v26 = vadd.f32 1.0, %v1246_v25 }
 0x954   : > { %1247 = vrcp.f32 %v566_v26 }
 0x95e   : > { %v1248_v27 = vpop.eup %1247 }
 0x95f   : > { %v580_v34 = vsub.f32 1.0, %v1248_v27  ;;  %v586_v36 = vmul.f32 %v1248_v27, %v1577_v14 }
 0x9b5   : > { %v571_v29 = vpop.permute.xlu1 %570 }
 0x9b6   : > { %v573_v30 = vmul.f32 %v1248_v27, %v571_v29 }
 0x9b8   : > { %575 = vrot.lane.b32.xlu0 %v573_v30, %s1377_s10 }
 0xa2a   : > { %v576_v31 = vpop.permute.xlu0 %575 }
 0xa2b   : > { %v578_v32 = vadd.f32 %v1055_v22, %v576_v31 }
 0xa2d   : > { %1249 = vtanh.f32 %v578_v32 }
 0xa37   : > { %v1250_v33 = vpop.eup %1249 }
 0xa38   : > { %582 = vrot.lane.b32.xlu1 %v1250_v33, %s1378_s11  ;;  %v1067_v33 = vld [vmem:[%s1493_s9 + $0x30] sm:$0xff] }
 0xaaa   : > { %v583_v35 = vpop.permute.xlu1 %582 }
 0xaab   : > { %v585_v37 = vmul.f32 %v583_v35, %v580_v34 }
 0xaad   : > { %v1595_v38 = vadd.f32 %v586_v36, %v585_v37 }
 0xaaf   : > { %v606_v39 = vpack.c.bf16 %v1595_v38, %v1595_v38 }
 0xab1   : > { %608 = vrot.lane.b32.xlu0 %v606_v39, %s1378_s11 }
 0xb23   : > { %v609_v40 = vpop.permute.xlu0 %608 }
 0xb24   : > { %1141 = vmatmul.mubr.msk.bf16.vlgmr.msra.gmra.mrb[8].mxu0 %vm242_vm2, %v609_v40 }
 0xb25   : > { %1153 = vmatpush3.bf16.msra.mxu0 %v1503_v1  ;;  %1156 = vmatprep.mubr.msk.bf16.mxu0 %vm1376_vm1, %v1375_v2 }
 0xb26   : > { %1154 = vmatprep.subr.bf16.mxu0 %v1375_v2 }
 0xb29   : > { %1155 = vmatpush3.bf16.msra.mxu0 %v1511_v3 }
 0xbf7   : > { %v647_v41 = vpop.f32.mrb[8].mxu0 }
 0xbf8   : > { %v648_v42 = vadd.f32 %v1534_v6, %v647_v41  ;;  %v1142_v43 = vpop.f32.mrb[9].mxu0 }
 0xbf9   : > { %v650_v44 = vpop.f32.mrb[10].mxu0 }
 0xbfa   : > { %661 = vrot.lane.b32.xlu1 %v648_v42, %s1377_s10  ;;  %v1143_v45 = vpop.f32.mrb[11].mxu0  ;;  %v653_v47 = vadd.f32 %v1059_v46, %v648_v42 }
 0xbfc   : > { %v1061_v48 = vmul.f32 -1.442695, %v653_v47 }
 0xbfe   : > { %1251 = vpow2.f32 %v1061_v48 }
 0xc08   : > { %v1252_v49 = vpop.eup %1251 }
 0xc09   : > { %v657_v50 = vadd.f32 1.0, %v1252_v49 }
 0xc0b   : > { %1253 = vrcp.f32 %v657_v50 }
 0xc15   : > { %v1254_v52 = vpop.eup %1253 }
 0xc16   : > { %v671_v58 = vsub.f32 1.0, %v1254_v52  ;;  %v677_v60 = vmul.f32 %v1254_v52, %v1595_v38 }
 0xc6c   : > { %v662_v53 = vpop.permute.xlu1 %661 }
 0xc6d   : > { %v664_v54 = vmul.f32 %v1254_v52, %v662_v53  ;;  %v1380_v53 = vmov 0  }
 0xc6e   : > { %1223 = vset.pattern.permute.xlu1 %v1380_v53  ;;  %1224 = vset.pattern.permute.xlu0 %v1380_v53 }
 0xc6f   : > { %666 = vrot.lane.b32.xlu0 %v664_v54, %s1377_s10  ;;  %v213_v54 = vld [vmem:[%s1730_s1] sm:$0xff] }
 0xce1   : > { %v667_v55 = vpop.permute.xlu0 %666 }
 0xce2   : > { %v669_v56 = vadd.f32 %v1059_v46, %v667_v55  ;;  %v316_v55 = vstv %s1648_s13 }
 0xce3   : > { %vm317_vm3 = vcmp.lt.s32.totalorder %v316_v55, %v213_v54 }
 0xce4   : > { %1255 = vtanh.f32 %v669_v56 }
 0xcee   : > { %v1256_v57 = vpop.eup %1255 }
 0xcef   : > { %673 = vrot.lane.b32.xlu1 %v1256_v57, %s1378_s11 }
 0xd61   : > { %v674_v59 = vpop.permute.xlu1 %673 }
 0xd62   : > { %v676_v61 = vmul.f32 %v674_v59, %v671_v58 }
 0xd64   : > { %v1612_v62 = vadd.f32 %v677_v60, %v676_v61  ;;  %v498_v60 = vstv %s497_s21 }
 0xd65   : > { %vm499_vm4 = vcmp.lt.s32.totalorder %v498_v60, %v213_v54 }
 0xd66   : > { %v697_v63 = vpack.c.bf16 %v1612_v62, %v1612_v62 }
 0xd68   : > { %699 = vrot.lane.b32.xlu0 %v697_v63, %s1378_s11  ;;  %v1046_v63 = vsel %vm317_vm3, 1.0, %v1375_v2 }
 0xdda   : > { %v700_v0 = vpop.permute.xlu0 %699 }
 0xddb   : > { %1149 = vmatmul.mubr.msk.bf16.vlgmr.msra.gmra.mrb[8].mxu1 %vm242_vm2, %v700_v0  ;;  %v589_v0 = vstv %s588_s22 }
 0xddc   : > { %1161 = vmatpush3.bf16.msra.mxu1 %v1503_v1  ;;  %1164 = vmatprep.mubr.msk.bf16.mxu1 %vm1376_vm1, %v1375_v2  ;;  %vm590_vm5 = vcmp.lt.s32.totalorder %v589_v0, %v213_v54 }
 0xddd   : > { %1162 = vmatprep.subr.bf16.mxu1 %v1375_v2 }
 0xde0   : > { %1163 = vmatpush3.bf16.msra.mxu1 %v1511_v3 }
 0xeae   : > { %v738_v4 = vpop.f32.mrb[8].mxu1 }
 0xeaf   : > { %v739_v5 = vadd.f32 %v1534_v6, %v738_v4  ;;  %v1150_v7 = vpop.f32.mrb[9].mxu1  ;;  %v1054_v4 = vsel %vm499_vm4, 1.0, %v1375_v2 }
 0xeb0   : > { %v741_v8 = vpop.f32.mrb[10].mxu1  ;;  %v953_v7 = vstv %s952_s26 }
 0xeb1   : > { %752 = vrot.lane.b32.xlu1 %v739_v5, %s1377_s10  ;;  %v1151_v9 = vpop.f32.mrb[11].mxu1  ;;  %v744_v11 = vadd.f32 %v1063_v10, %v739_v5  ;;  %v1058_v5 = vsel %vm590_vm5, 1.0, %v1375_v2  ;;  %vm954_vm7 = vcmp.lt.s32.totalorder %v953_v7, %v213_v54 }
 0xeb2   : > { %v1074_v9 = vsel %vm954_vm7, 1.0, %v1375_v2 }
 0xeb3   : > { %v1065_v12 = vmul.f32 -1.442695, %v744_v11 }
 0xeb5   : > { %1257 = vpow2.f32 %v1065_v12 }
 0xebf   : > { %v1258_v1 = vpop.eup %1257 }
 0xec0   : > { %v748_v13 = vadd.f32 1.0, %v1258_v1 }
 0xec2   : > { %1259 = vrcp.f32 %v748_v13 }
 0xecc   : > { %v1260_v15 = vpop.eup %1259 }
 0xecd   : > { %v762_v20 = vsub.f32 1.0, %v1260_v15  ;;  %v768_v22 = vmul.f32 %v1260_v15, %v1612_v62 }
 0xf23   : > { %v753_v16 = vpop.permute.xlu1 %752 }
 0xf24   : > { %v755_v17 = vmul.f32 %v1260_v15, %v753_v16  ;;  %v407_v15 = vstv %s406_s27 }
 0xf25   : > { %vm408_vm8 = vcmp.lt.s32.totalorder %v407_v15, %v213_v54 }
 0xf26   : > { %757 = vrot.lane.b32.xlu0 %v755_v17, %s1377_s10 }
 0xf98   : > { %v758_v3 = vpop.permute.xlu0 %757 }
 0xf99   : > { %v760_v18 = vadd.f32 %v1063_v10, %v758_v3  ;;  %v1071_v10 = vld [vmem:[%s1493_s9 + $0x38] sm:$0xff]  ;;  %s981_s9 = sshll.u32 %s1381_s5, 4  ;;  %s982_s9 = int_to_ptr.vmem [resolvable:$true] %s981_s9 }
 0xf9a   : > { %s1305_s18 = scalar_lea.vmem %s982_s9, 128  ;;  %p1312_p6 = scmp.lt.s32.totalorder %s982_s9, %s982_s9 }
 0xf9b   : > { %1261 = vtanh.f32 %v760_v18  ;;  %v680_v18 = vstv %s679_s28  ;;  %p1306_p8 = scmp.ne.s32.totalorder %s982_s9, %s1305_s18  ;;  %p1313_p10 = scmp.lt.s32.totalorder %s1305_s18, %s1305_s18 }
 0xf9c   : > { %vm681_vm9 = vcmp.lt.s32.totalorder %v680_v18, %v213_v54 }
 0xf9d   : > { %p1307_p4 = pnand %p1306_p8, %p1179_p7  ;;  %p1314_p12 = por %p1313_p10, %p1312_p6 }
 0xf9f   : > { %p1308_p5 = pneg %p1307_p4 }
 0xfa1   : > { %p1315_p0 = pnand %p1314_p12, %p1308_p5 }
 0xfa5   : > { %v1262_v19 = vpop.eup %1261 }
 0xfa6   : > { %764 = vrot.lane.b32.xlu1 %v1262_v19, %s1378_s11  ;;  %v1050_v19 = vsel %vm408_vm8, 1.0, %v1375_v2 }
0x1018   : > { %v765_v21 = vpop.permute.xlu1 %764 }
0x1019   : > { %v767_v23 = vmul.f32 %v765_v21, %v762_v20  ;;  %v862_v20 = vstv %s861_s29  ;;  %v1062_v21 = vsel %vm681_vm9, 1.0, %v1375_v2 }
0x101a   : > { %vm863_vm10 = vcmp.lt.s32.totalorder %v862_v20, %v213_v54 }
0x101b   : > { %v1629_v24 = vadd.f32 %v768_v22, %v767_v23  ;;  %v1070_v22 = vsel %vm863_vm10, 1.0, %v1375_v2 }
0x101d   : > { %v788_v25 = vpack.c.bf16 %v1629_v24, %v1629_v24 }
0x101f   : > { %790 = vrot.lane.b32.xlu0 %v788_v25, %s1378_s11 }
0x1091   : > { %v791_v26 = vpop.permute.xlu0 %790 }
0x1092   : > { %1157 = vmatmul.mubr.msk.bf16.vlgmr.msra.gmra.mrb[12].mxu0 %vm242_vm2, %v791_v26 }
0x1165   : > { %v829_v27 = vpop.f32.mrb[12].mxu0 }
0x1166   : > { %v830_v29 = vadd.f32 %v1534_v6, %v829_v27  ;;  %v1158_v30 = vpop.f32.mrb[13].mxu0 }
0x1167   : > { %v832_v31 = vpop.f32.mrb[14].mxu0 }
0x1168   : > { %843 = vrot.lane.b32.xlu1 %v830_v29, %s1377_s10  ;;  %v1159_v32 = vpop.f32.mrb[15].mxu0  ;;  %v835_v34 = vadd.f32 %v1067_v33, %v830_v29 }
0x116a   : > { %v1069_v35 = vmul.f32 -1.442695, %v835_v34 }
0x116c   : > { %1263 = vpow2.f32 %v1069_v35 }
0x1176   : > { %v1264_v36 = vpop.eup %1263 }
0x1177   : > { %v839_v37 = vadd.f32 1.0, %v1264_v36 }
0x1179   : > { %1265 = vrcp.f32 %v839_v37 }
0x1183   : > { %v1266_v39 = vpop.eup %1265 }
0x1184   : > { %v853_v45 = vsub.f32 1.0, %v1266_v39  ;;  %v859_v47 = vmul.f32 %v1266_v39, %v1629_v24 }
0x11da   : > { %v844_v40 = vpop.permute.xlu1 %843 }
0x11db   : > { %v846_v41 = vmul.f32 %v1266_v39, %v844_v40 }
0x11dd   : > { %848 = vrot.lane.b32.xlu0 %v846_v41, %s1377_s10 }
0x124f   : > { %v849_v42 = vpop.permute.xlu0 %848 }
0x1250   : > { %v851_v43 = vadd.f32 %v1067_v33, %v849_v42 }
0x1252   : > { %1267 = vtanh.f32 %v851_v43 }
0x125c   : > { %v1268_v44 = vpop.eup %1267 }
0x125d   : > { %855 = vrot.lane.b32.xlu1 %v1268_v44, %s1378_s11  ;;  %v227_v44 = vld [vmem:[#allocation6] sm:$0xff] }
0x12cf   : > { %v856_v46 = vpop.permute.xlu1 %855 }
0x12d0   : > { %v858_v48 = vmul.f32 %v856_v46, %v853_v45 }
0x12d2   : > { %v1641_v49 = vadd.f32 %v859_v47, %v858_v48 }
0x12d4   : > { %v879_v50 = vpack.c.bf16 %v1641_v49, %v1641_v49 }
0x12d6   : > { %881 = vrot.lane.b32.xlu0 %v879_v50, %s1378_s11 }
0x1348   : > { %v882_v52 = vpop.permute.xlu0 %881 }
0x1349   : > { %1165 = vmatmul.mubr.msk.bf16.vlgmr.msra.gmra.mrb[12].mxu1 %vm242_vm2, %v882_v52 }
0x141c   : > { %v920_v56 = vpop.f32.mrb[12].mxu1 }
0x141d   : > { %v921_v57 = vadd.f32 %v1534_v6, %v920_v56  ;;  %v1166_v58 = vpop.f32.mrb[13].mxu1  ;;  %v771_v6 = vstv %s770_s25 }
0x141e   : > { %v923_v59 = vpop.f32.mrb[14].mxu1  ;;  %vm772_vm6 = vcmp.lt.s32.totalorder %v771_v6, %v213_v54 }
0x141f   : > { %934 = vrot.lane.b32.xlu1 %v921_v57, %s1377_s10  ;;  %v1167_v61 = vpop.f32.mrb[15].mxu1  ;;  %v1066_v8 = vsel %vm772_vm6, 1.0, %v1375_v2  ;;  %v926_v11 = vadd.f32 %v1071_v10, %v921_v57 }
0x1421   : > { %v1073_v12 = vmul.f32 -1.442695, %v926_v11 }
0x1423   : > { %322 = vperm.xlu1 %1223, %v1046_v63   ;;  %1269 = vpow2.f32 %v1073_v12 }
0x1427   : > { %504 = vperm.xlu1 %1223, %v1054_v4  }
0x142b   : > { %595 = vperm.xlu1 %1223, %v1058_v5  }
0x142d   : > { %v1270_v1 = vpop.eup %1269 }
0x142e   : > { %v930_v13 = vadd.f32 1.0, %v1270_v1 }
0x142f   : > { %777 = vperm.xlu1 %1223, %v1066_v8  }
0x1430   : > { %1271 = vrcp.f32 %v930_v13 }
0x1433   : > { %959 = vperm.xlu1 %1223, %v1074_v9  }
0x143a   : > { %v1272_v16 = vpop.eup %1271 }
0x1491   : > { %v935_v17 = vpop.permute.xlu1 %934 }
0x1492   : > { %v937_v3 = vmul.f32 %v1272_v16, %v935_v17 }
0x1494   : > { %939 = vrot.lane.b32.xlu0 %v937_v3, %s1377_s10 }
0x1498   : > { %413 = vperm.xlu0 %1224, %v1050_v19  }
0x149c   : > { %686 = vperm.xlu0 %1224, %v1062_v21  }
0x14a0   : > { %868 = vperm.xlu0 %1224, %v1070_v22  }
0x14a2   : > { %v323_v23 = vpop.permute.xlu1 %322 }
0x14a3   : > { %v325_v25 = vmul.f32 %v323_v23, %v1541_v28 }
0x14a5   : > { %327 = vrot.lane.b32.xlu1 %v325_v25, %s1378_s11 }
0x14a6   : > { %v505_v26 = vpop.permute.xlu1 %504 }
0x14a7   : > { %v507_v27 = vmul.f32 %v505_v26, %v1577_v14 }
0x14a9   : > { %509 = vrot.lane.b32.xlu1 %v507_v27, %s1378_s11 }
0x14aa   : > { %v596_v32 = vpop.permute.xlu1 %595 }
0x14ab   : > { %v598_v34 = vmul.f32 %v596_v32, %v1595_v38  ;;  %v950_v38 = vmul.f32 %v1272_v16, %v1641_v49 }
0x14ae   : > { %v778_v14 = vpop.permute.xlu1 %777 }
0x14af   : > { %v780_v37 = vmul.f32 %v778_v14, %v1629_v24 }
0x14b2   : > { %v960_v42 = vpop.permute.xlu1 %959 }
0x1506   : > { %v940_v29 = vpop.permute.xlu0 %939 }
0x1507   : > { %v942_v30 = vadd.f32 %v1071_v10, %v940_v29 }
0x1509   : > { %1273 = vtanh.f32 %v942_v30 }
0x1513   : > { %v1274_v31 = vpop.eup %1273 }
0x1514   : > { %946 = vrot.lane.b32.xlu0 %v1274_v31, %s1378_s11 }
0x1517   : > { %v414_v33 = vpop.permute.xlu0 %413  ;;  %v328_v24 = vpop.permute.xlu1 %327 }
0x1518   : > { %v416_v2 = vmul.f32 %v414_v33, %v1559_v51  ;;  %v944_v51 = vsub.f32 1.0, %v1272_v16  ;;  %v330_v46 = vadd.f32 %v328_v24, %v227_v44 }
0x151a   : > { %418 = vrot.lane.b32.xlu0 %v416_v2, %s1378_s11 }
0x151b   : > { %v687_v28 = vpop.permute.xlu0 %686  ;;  %v510_v48 = vpop.permute.xlu1 %509 }
0x151c   : > { %v689_v35 = vmul.f32 %v687_v28, %v1612_v62 }
0x151e   : > { %691 = vrot.lane.b32.xlu1 %v689_v35, %s1378_s11  ;;  %600 = vrot.lane.b32.xlu0 %v598_v34, %s1378_s11 }
0x151f   : > { %v869_v36 = vpop.permute.xlu0 %868 }
0x1520   : > { %v871_v39 = vmul.f32 %v869_v36, %v1641_v49 }
0x1522   : > { %873 = vrot.lane.b32.xlu1 %v871_v39, %s1378_s11  ;;  %782 = vrot.lane.b32.xlu0 %v780_v37, %s1378_s11 }
0x1586   : > { %v947_v40 = vpop.permute.xlu0 %946 }
0x1587   : > { %v949_v41 = vmul.f32 %v947_v40, %v944_v51 }
0x1589   : > { %v951_v62 = vadd.f32 %v950_v38, %v949_v41 }
0x158b   : > { %969 = vrot.lane.b32.xlu1 %v951_v62, %s1378_s11  ;;  %v962_v43 = vmul.f32 %v960_v42, %v951_v62 }
0x158c   : > { %v419_v45 = vpop.permute.xlu0 %418 }
0x158d   : > { %964 = vrot.lane.b32.xlu0 %v962_v43, %s1378_s11  ;;  %v421_v47 = vadd.f32 %v419_v45, %v330_v46 }
0x158f   : > { %v512_v50 = vadd.f32 %v510_v48, %v421_v47 }
0x1590   : > { %v601_v52 = vpop.permute.xlu0 %600  ;;  %v692_v54 = vpop.permute.xlu1 %691 }
0x1591   : > { %v603_v53 = vadd.f32 %v601_v52, %v512_v50 }
0x1593   : > { %v694_v49 = vadd.f32 %v692_v54, %v603_v53 }
0x1594   : > { %v783_v55 = vpop.permute.xlu0 %782  ;;  %v874_v56 = vpop.permute.xlu1 %873 }
0x1595   : > { %v785_v57 = vadd.f32 %v783_v55, %v694_v49 }
0x1597   : > { %v876_v59 = vadd.f32 %v874_v56, %v785_v57 }
0x15fd   : > { %v970_v58 = vpop.permute.xlu1 %969 }
0x15fe   : > { %972 = vst.msk [vmem:[#allocation2] sm:$0xff] %vm242_vm2, %v970_v58 }
0x15ff   : > { %v965_v60 = vpop.permute.xlu0 %964 }
0x1600   : > { %v967_v61 = vadd.f32 %v965_v60, %v876_v59 }
0x1602   : > { %973 = vst.msk [vmem:[#allocation6] sm:$0xff] %vm242_vm2, %v967_v61 }
0x1603   : > { %1318 = shalt.err (!%p1315_p0)
}
0x1604   : > { %s1319_s6 = scalar_lea.hbm %s1733_s4, 128 }
0x1605   : > { %p1320_p1 = scmp.ne.s32.totalorder %s1733_s4, %s1319_s6  ;;  %p1325_p13 = scmp.lt.u32.totalorder %s1319_s6, %s1733_s4 }
0x1607   : > { %p1321_p2 = pnand %p1320_p1, %p1179_p7 }
0x1609   : > { %p1322_p11 = pneg %p1321_p2 }
0x160b   : > { %p1327_p3 = pnand %p1325_p13, %p1322_p11 }
0x160d   : > { %1330 = shalt.err (!%p1327_p3)
}
0x160e   : > { %1171 = dma.vmem_to_hbm [thread:$0]  (%p1179_p7), %s982_s9, 128, %s1733_s4, [#allocation5]  }
0x160f   : > { %1352 = dma.done.wait (%p1179_p7), [#allocation5], 128  }
0x1610   : > { %1354 = vsyncadd (%p1179_p7), [#allocation5], 4294967168 }
0x1611 PF: > { %p15_p9 = scmp.ge.s32.totalorder %s1429_s20, 4   ;;  %s1737_s15 = smov %s1361_s16 }
0x1612   : > { %s1738_s16 = smov %s1365_s17  ;;  %s1739_s17 = smov %s1439_s23 }
0x1613   : > { %s1740_s18 = smov %s1429_s20  ;;  %17 = sbr.rel (!%p15_p9) target bundleno = 4 (0x4), region = 84 }
0x161a   :  { %994 = vsyncpa [#allocation4], 1 }
0x161b   :  { %996 = vsyncpa [#allocation4 + $0x1], 1 }
0x161c   :  { %997 = vsyncpa [#allocation5], 1 }
0x161d   :  { %999 = vsyncpa [#allocation5 + $0x1], 1 }

</bundles_post_ra>
